<compile_context>
chip_gen: v7x
topology: tpu7x:2x2x1
jax: 0.10.0
libtpu: 0.0.40
codegen_flags: <defaults>
</compile_context>

<pallas_src>
import functools

import jax
import jax.numpy as jnp
from jax.experimental import pallas as pl
from jax.experimental.pallas import tpu as pltpu

KH = 3
KW = 3
STRIDE = 2
BN_EPS = 1e-5


def _out_dim(d: int) -> int:
    # matches Conv2d.compute_outp_dim with kernel=3, stride=2, padding=0
    return (d - KH) // STRIDE + 1


# ---------------------------------------------------------------------------
# Fused kernel: all conv layers + BN + ReLU + flatten + Linear, one grid step
# per batch element, activations VMEM-resident throughout.
# ---------------------------------------------------------------------------
def _fused_forward_kernel(x_ref, *refs, num_layers: int):
    layer_refs = refs[: 4 * num_layers]
    wp_ref = refs[4 * num_layers]
    pb_ref = refs[4 * num_layers + 1]
    o_ref = refs[4 * num_layers + 2]

    # (T, F*Cin) bf16 activation; columns ordered freq-major, channel-minor.
    x = x_ref[0]
    for layer in range(num_layers):
        sh_ref, bmat_ref, scale_ref, shift_ref = layer_refs[4 * layer: 4 * layer + 4]
        acc = None
        for kh in range(KH):
            # Stride-2 time-tap selection as an exact one-hot matmul:
            #   xh[i, :] = x[2*i + kh, :]
            xh = jnp.dot(sh_ref[kh], x,
                         preferred_element_type=jnp.float32).astype(jnp.bfloat16)
            # Stride-2 freq taps + channel mixing folded into one matrix:
            #   part[i, j*Cout+co] = sum_{kw,ci} x[2i+kh, 2j+kw, ci] * w[kh,kw,ci,co]
            part = jnp.dot(xh, bmat_ref[kh], preferred_element_type=jnp.float32)
            acc = part if acc is None else acc + part
        # Folded (eval-mode) BatchNorm + ReLU epilogue in f32.
        y = jnp.maximum(acc * scale_ref[...] + shift_ref[...], 0.0)
        x = y.astype(jnp.bfloat16)                 # becomes next layer's (H, W*Cin)

    # Fused flatten(C, F') + Linear: weight rows pre-permuted to f*C + c, so this
    # is a single (T', F'*C) @ (F'*C, E) matmul per batch element.
    out = jnp.dot(x, wp_ref[...], preferred_element_type=jnp.float32) + pb_ref[...]
    o_ref[0] = out


# ---------------------------------------------------------------------------
# Wrapper (pallas_call glue)
# ---------------------------------------------------------------------------
def _time_select_mats(t: int, num_layers: int):
    """One-hot (KH, T_out, T_in) matrices implementing the stride-2 time taps."""
    mats = []
    h = t
    for _ in range(num_layers):
        ho = _out_dim(h)
        rows = jnp.arange(ho)[:, None]
        cols = jnp.arange(h)[None, :]
        sh = jnp.stack([(cols == STRIDE * rows + kh) for kh in range(KH)])
        mats.append(sh.astype(jnp.bfloat16))
        h = ho
    return mats


def conv2d_proj_forward(inp, kparams):
    """inp: (N, T, F) float32 -> (N, T', embed_dim), matching Conv2dProj.forward."""
    n, t, f = inp.shape
    num_layers = len(kparams["layers"])
    t_out = t
    for _ in range(num_layers):
        t_out = _out_dim(t_out)
    e = kparams["embed_dim"]

    x = inp.astype(jnp.bfloat16)          # bf16 MXU operands, half the input DMA bytes
    sh_mats = _time_select_mats(t, num_layers)

    args = [x]
    in_specs = [pl.BlockSpec((1, t, f), lambda b: (b, 0, 0))]
    for sh, (bmat, scale, shift) in zip(sh_mats, kparams["layers"]):
        args += [sh, bmat, scale, shift]
        in_specs += [
            pl.BlockSpec(sh.shape, lambda b: (0, 0, 0)),
            pl.BlockSpec(bmat.shape, lambda b: (0, 0, 0)),
            pl.BlockSpec(scale.shape, lambda b: (0, 0)),
            pl.BlockSpec(shift.shape, lambda b: (0, 0)),
        ]
    args += [kparams["proj_w"], kparams["proj_b"]]
    in_specs += [
        pl.BlockSpec(kparams["proj_w"].shape, lambda b: (0, 0)),
        pl.BlockSpec(kparams["proj_b"].shape, lambda b: (0, 0)),
    ]

    return pl.pallas_call(
        functools.partial(_fused_forward_kernel, num_layers=num_layers),
        out_shape=jax.ShapeDtypeStruct((n, t_out, e), jnp.float32),
        grid=(n,),
        in_specs=in_specs,
        out_specs=pl.BlockSpec((1, t_out, e), lambda b: (b, 0, 0)),
        compiler_params=pltpu.CompilerParams(
            dimension_semantics=("parallel",),      # batch shards across v7x's 2 TCs
            vmem_limit_bytes=32 * 1024 * 1024,      # explicit VMEM budget (v5e default is 16 MiB)
        ),
    )(*args)


# ---------------------------------------------------------------------------
# Parameter preparation: fold conv bias + eval-mode BN, bake the stride-2 freq
# taps into per-kh matmul matrices, pre-permute the projection weight, cast to bf16.
# ---------------------------------------------------------------------------
def prepare_kernel_params(raw, input_size):
    layers = []
    w_dim = input_size
    for (w, b, gamma, beta, mean, var) in raw["conv"]:
        cout, cin = w.shape[0], w.shape[1]
        wo = _out_dim(w_dim)
        # sel[kw, q, j] = 1 iff q == 2*j + kw  (stride-2 freq tap selection)
        q = jnp.arange(w_dim)[:, None]
        j = jnp.arange(wo)[None, :]
        sel = jnp.stack([(q == STRIDE * j + kw) for kw in range(KW)]).astype(jnp.float32)
        # OIHW -> (KH, KW, Cin, Cout); fold kw taps + channel mixing:
        # bmat[kh, q*Cin+ci, j*Cout+co] = sum_kw sel[kw,q,j] * w[kh,kw,ci,co]
        w_t = jnp.transpose(w, (2, 3, 1, 0)).astype(jnp.float32)
        bmat = jnp.einsum("wqj,hwio->hqijo", sel, w_t)
        bmat = bmat.reshape(KH, w_dim * cin, wo * cout).astype(jnp.bfloat16)
        # Eval-mode BN folded with the conv bias; tiled to the (1, Wo*Cout) layout.
        scale_c = gamma / jnp.sqrt(var + BN_EPS)
        shift_c = beta + (b - mean) * scale_c
        scale = jnp.tile(scale_c, wo).reshape(1, -1).astype(jnp.float32)
        shift = jnp.tile(shift_c, wo).reshape(1, -1).astype(jnp.float32)
        layers.append((bmat, scale, shift))
        w_dim = wo
    # PyTorch flattens (C, F'): proj_w column index is c*F' + f.  Pre-permute rows
    # to f*C + c so the kernel's (T', F'*C) activation multiplies it directly.
    proj_w, proj_b = raw["proj_w"], raw["proj_b"]
    e, in_feat = proj_w.shape
    cout = raw["conv"][-1][0].shape[0]
    f_last = in_feat // cout
    wp = jnp.transpose(proj_w.reshape(e, cout, f_last), (2, 1, 0)).reshape(f_last * cout, e)
    return {
        "layers": layers,
        "proj_w": wp.astype(jnp.bfloat16),
        "proj_b": proj_b.reshape(1, -1).astype(jnp.float32),
        "embed_dim": e,
    }


# ---------------------------------------------------------------------------
# Pure-JAX reference (mirrors the PyTorch NCHW forward exactly, f32 HIGHEST)
# ---------------------------------------------------------------------------
def torch_reference(inp, raw):
    hp = jax.lax.Precision.HIGHEST
    x = inp[:, None]                                     # (N, 1, T, F) NCHW
    for (w, b, gamma, beta, mean, var) in raw["conv"]:
        x = jax.lax.conv_general_dilated(
            x, w, (STRIDE, STRIDE), "VALID",
            dimension_numbers=("NCHW", "OIHW", "NCHW"), precision=hp)
        x = x + b[None, :, None, None]
        inv = jax.lax.rsqrt(var + BN_EPS)
        x = (x - mean[None, :, None, None]) * inv[None, :, None, None]
        x = x * gamma[None, :, None, None] + beta[None, :, None, None]
        x = jnp.maximum(x, 0.0)
    x = jnp.transpose(x, (0, 2, 1, 3))                   # N, T', C, F'
    n, t = x.shape[:2]
    x = x.reshape(n, t, -1)
    return jnp.dot(x, raw["proj_w"].T, precision=hp) + raw["proj_b"]


# ---------------------------------------------------------------------------
# Deterministic parameter init (shapes from Conv2dProj.__init__)
# ---------------------------------------------------------------------------
def init_raw_params(key, input_size, embed_dim, in_channels, conv_channels, num_layers):
    raw_conv = []
    cin = in_channels
    f = input_size
    for _ in range(num_layers):
        key, k1, k2, k3, k4, k5, k6 = jax.random.split(key, 7)
        w = jax.random.normal(k1, (conv_channels, cin, KH, KW), jnp.float32) * 0.1
        b = jax.random.normal(k2, (conv_channels,), jnp.float32) * 0.1
        gamma = jax.random.uniform(k3, (conv_channels,), jnp.float32, 0.5, 1.5)
        beta = jax.random.normal(k4, (conv_channels,), jnp.float32) * 0.1
        mean = jax.random.normal(k5, (conv_channels,), jnp.float32) * 0.1
        var = jax.random.uniform(k6, (conv_channels,), jnp.float32, 0.5, 1.5)
        raw_conv.append((w, b, gamma, beta, mean, var))
        cin = conv_channels
        f = _out_dim(f)
    key, kw_, kb_ = jax.random.split(key, 3)
    proj_w = jax.random.normal(kw_, (embed_dim, f * conv_channels), jnp.float32) * 0.05
    proj_b = jax.random.normal(kb_, (embed_dim,), jnp.float32) * 0.05
    return key, {"conv": raw_conv, "proj_w": proj_w, "proj_b": proj_b}


if __name__ == "__main__":
    # Small shapes consistent with the module's forward: N x T x F input.
    N, T, F = 2, 16, 16
    EMBED_DIM, IN_CHANNELS, CONV_CHANNELS, NUM_LAYERS = 32, 1, 8, 2

    key = jax.random.PRNGKey(0)
    key, raw = init_raw_params(key, F, EMBED_DIM, IN_CHANNELS, CONV_CHANNELS, NUM_LAYERS)
    kparams = prepare_kernel_params(raw, F)
    key, kx = jax.random.split(key)
    x = jax.random.normal(kx, (N, T, F), jnp.float32)

    out = jax.block_until_ready(conv2d_proj_forward(x, kparams))

    # Validate against the NCHW reference that mirrors the PyTorch forward.
    ref = jax.block_until_ready(torch_reference(x, raw))
    t_out = _out_dim(_out_dim(T))
    assert out.shape == (N, t_out, EMBED_DIM), out.shape
    # bf16 MXU operands (per perf review): compare with a relative-error budget.
    rel_err = float(jnp.linalg.norm(out - ref) / (jnp.linalg.norm(ref) + 1e-12))
    if not rel_err < 3e-2:
        raise RuntimeError(f"Pallas Conv2dProj does not match reference (rel err {rel_err})")
    print("KERNEL_OK")
</pallas_src>

<mosaic_0001>
module attributes {stable_mosaic.version = 11 : i64} {
  func.func @_fused_forward_kernel(%arg0: i32, %arg1: memref<1x16x16xbf16, #tpu.memory_space<vmem>>, %arg2: memref<3x7x16xbf16, #tpu.memory_space<vmem>>, %arg3: memref<3x16x56xbf16, #tpu.memory_space<vmem>>, %arg4: memref<1x56xf32, #tpu.memory_space<vmem>>, %arg5: memref<1x56xf32, #tpu.memory_space<vmem>>, %arg6: memref<3x3x7xbf16, #tpu.memory_space<vmem>>, %arg7: memref<3x56x24xbf16, #tpu.memory_space<vmem>>, %arg8: memref<1x24xf32, #tpu.memory_space<vmem>>, %arg9: memref<1x24xf32, #tpu.memory_space<vmem>>, %arg10: memref<24x32xbf16, #tpu.memory_space<vmem>>, %arg11: memref<1x32xf32, #tpu.memory_space<vmem>>, %arg12: memref<1x3x32xf32, #tpu.memory_space<vmem>>) attributes {dimension_semantics = [#tpu.dimension_semantics<parallel>], iteration_bounds = array<i64: 2>, scalar_prefetch = 0 : i64, scratch_operands = 0 : i64, tpu.core_type = #tpu.core_type<tc>, window_params = [{transform_indices = @transform_0, window_bounds = array<i64: 1, 16, 16>}, {pipeline_mode = #tpu.pipeline_mode<synchronous>, transform_indices = @transform_1, window_bounds = array<i64: 3, 7, 16>}, {pipeline_mode = #tpu.pipeline_mode<synchronous>, transform_indices = @transform_2, window_bounds = array<i64: 3, 16, 56>}, {pipeline_mode = #tpu.pipeline_mode<synchronous>, transform_indices = @transform_3, window_bounds = array<i64: 1, 56>}, {pipeline_mode = #tpu.pipeline_mode<synchronous>, transform_indices = @transform_4, window_bounds = array<i64: 1, 56>}, {pipeline_mode = #tpu.pipeline_mode<synchronous>, transform_indices = @transform_5, window_bounds = array<i64: 3, 3, 7>}, {pipeline_mode = #tpu.pipeline_mode<synchronous>, transform_indices = @transform_6, window_bounds = array<i64: 3, 56, 24>}, {pipeline_mode = #tpu.pipeline_mode<synchronous>, transform_indices = @transform_7, window_bounds = array<i64: 1, 24>}, {pipeline_mode = #tpu.pipeline_mode<synchronous>, transform_indices = @transform_8, window_bounds = array<i64: 1, 24>}, {pipeline_mode = #tpu.pipeline_mode<synchronous>, transform_indices = @transform_9, window_bounds = array<i64: 24, 32>}, {pipeline_mode = #tpu.pipeline_mode<synchronous>, transform_indices = @transform_10, window_bounds = array<i64: 1, 32>}, {transform_indices = @transform_11, window_bounds = array<i64: 1, 3, 32>}]} {
    %c0 = arith.constant 0 : index
    %c0_0 = arith.constant 0 : index
    %c0_1 = arith.constant 0 : index
    %0 = vector.load %arg1[%c0, %c0_0, %c0_1] : memref<1x16x16xbf16, #tpu.memory_space<vmem>>, vector<1x16x16xbf16>
    %1 = vector.shape_cast %0 : vector<1x16x16xbf16> to vector<16x16xbf16>
    %c0_2 = arith.constant 0 : index
    %c0_3 = arith.constant 0 : index
    %c0_4 = arith.constant 0 : index
    %2 = vector.load %arg2[%c0_2, %c0_3, %c0_4] : memref<3x7x16xbf16, #tpu.memory_space<vmem>>, vector<1x7x16xbf16>
    %3 = vector.shape_cast %2 : vector<1x7x16xbf16> to vector<7x16xbf16>
    %cst = arith.constant dense<0.000000e+00> : vector<7x16xf32>
    %4 = tpu.matmul %3, %1, %cst {dimension_numbers = #tpu.dot_dimension_numbers<[1], [0], [0], [1], [0, 0, 1, 1], [], []>} : vector<7x16xbf16>, vector<16x16xbf16>, vector<7x16xf32> -> vector<7x16xf32>
    %5 = arith.truncf %4 : vector<7x16xf32> to vector<7x16xbf16>
    %c0_5 = arith.constant 0 : index
    %c0_6 = arith.constant 0 : index
    %c0_7 = arith.constant 0 : index
    %6 = vector.load %arg3[%c0_5, %c0_6, %c0_7] : memref<3x16x56xbf16, #tpu.memory_space<vmem>>, vector<1x16x56xbf16>
    %7 = vector.shape_cast %6 : vector<1x16x56xbf16> to vector<16x56xbf16>
    %cst_8 = arith.constant dense<0.000000e+00> : vector<7x56xf32>
    %8 = tpu.matmul %5, %7, %cst_8 {dimension_numbers = #tpu.dot_dimension_numbers<[1], [0], [0], [1], [0, 0, 1, 1], [], []>} : vector<7x16xbf16>, vector<16x56xbf16>, vector<7x56xf32> -> vector<7x56xf32>
    %c1 = arith.constant 1 : index
    %c0_9 = arith.constant 0 : index
    %c0_10 = arith.constant 0 : index
    %9 = vector.load %arg2[%c1, %c0_9, %c0_10] : memref<3x7x16xbf16, #tpu.memory_space<vmem>>, vector<1x7x16xbf16>
    %10 = vector.shape_cast %9 : vector<1x7x16xbf16> to vector<7x16xbf16>
    %cst_11 = arith.constant dense<0.000000e+00> : vector<7x16xf32>
    %11 = tpu.matmul %10, %1, %cst_11 {dimension_numbers = #tpu.dot_dimension_numbers<[1], [0], [0], [1], [0, 0, 1, 1], [], []>} : vector<7x16xbf16>, vector<16x16xbf16>, vector<7x16xf32> -> vector<7x16xf32>
    %12 = arith.truncf %11 : vector<7x16xf32> to vector<7x16xbf16>
    %c1_12 = arith.constant 1 : index
    %c0_13 = arith.constant 0 : index
    %c0_14 = arith.constant 0 : index
    %13 = vector.load %arg3[%c1_12, %c0_13, %c0_14] : memref<3x16x56xbf16, #tpu.memory_space<vmem>>, vector<1x16x56xbf16>
    %14 = vector.shape_cast %13 : vector<1x16x56xbf16> to vector<16x56xbf16>
    %cst_15 = arith.constant dense<0.000000e+00> : vector<7x56xf32>
    %15 = tpu.matmul %12, %14, %cst_15 {dimension_numbers = #tpu.dot_dimension_numbers<[1], [0], [0], [1], [0, 0, 1, 1], [], []>} : vector<7x16xbf16>, vector<16x56xbf16>, vector<7x56xf32> -> vector<7x56xf32>
    %16 = arith.addf %8, %15 : vector<7x56xf32>
    %c2 = arith.constant 2 : index
    %c0_16 = arith.constant 0 : index
    %c0_17 = arith.constant 0 : index
    %17 = vector.load %arg2[%c2, %c0_16, %c0_17] : memref<3x7x16xbf16, #tpu.memory_space<vmem>>, vector<1x7x16xbf16>
    %18 = vector.shape_cast %17 : vector<1x7x16xbf16> to vector<7x16xbf16>
    %cst_18 = arith.constant dense<0.000000e+00> : vector<7x16xf32>
    %19 = tpu.matmul %18, %1, %cst_18 {dimension_numbers = #tpu.dot_dimension_numbers<[1], [0], [0], [1], [0, 0, 1, 1], [], []>} : vector<7x16xbf16>, vector<16x16xbf16>, vector<7x16xf32> -> vector<7x16xf32>
    %20 = arith.truncf %19 : vector<7x16xf32> to vector<7x16xbf16>
    %c2_19 = arith.constant 2 : index
    %c0_20 = arith.constant 0 : index
    %c0_21 = arith.constant 0 : index
    %21 = vector.load %arg3[%c2_19, %c0_20, %c0_21] : memref<3x16x56xbf16, #tpu.memory_space<vmem>>, vector<1x16x56xbf16>
    %22 = vector.shape_cast %21 : vector<1x16x56xbf16> to vector<16x56xbf16>
    %cst_22 = arith.constant dense<0.000000e+00> : vector<7x56xf32>
    %23 = tpu.matmul %20, %22, %cst_22 {dimension_numbers = #tpu.dot_dimension_numbers<[1], [0], [0], [1], [0, 0, 1, 1], [], []>} : vector<7x16xbf16>, vector<16x56xbf16>, vector<7x56xf32> -> vector<7x56xf32>
    %24 = arith.addf %16, %23 : vector<7x56xf32>
    %c0_23 = arith.constant 0 : index
    %c0_24 = arith.constant 0 : index
    %25 = vector.load %arg4[%c0_23, %c0_24] : memref<1x56xf32, #tpu.memory_space<vmem>>, vector<1x56xf32>
    %26 = vector.broadcast %25 : vector<1x56xf32> to vector<7x56xf32>
    %27 = arith.mulf %24, %26 : vector<7x56xf32>
    %c0_25 = arith.constant 0 : index
    %c0_26 = arith.constant 0 : index
    %28 = vector.load %arg5[%c0_25, %c0_26] : memref<1x56xf32, #tpu.memory_space<vmem>>, vector<1x56xf32>
    %29 = vector.broadcast %28 : vector<1x56xf32> to vector<7x56xf32>
    %30 = arith.addf %27, %29 : vector<7x56xf32>
    %cst_27 = arith.constant 0.000000e+00 : f32
    %31 = vector.broadcast %cst_27 : f32 to vector<7x56xf32>
    %32 = arith.maximumf %30, %31 : vector<7x56xf32>
    %33 = arith.truncf %32 : vector<7x56xf32> to vector<7x56xbf16>
    %c0_28 = arith.constant 0 : index
    %c0_29 = arith.constant 0 : index
    %c0_30 = arith.constant 0 : index
    %34 = vector.load %arg6[%c0_28, %c0_29, %c0_30] : memref<3x3x7xbf16, #tpu.memory_space<vmem>>, vector<1x3x7xbf16>
    %35 = vector.shape_cast %34 : vector<1x3x7xbf16> to vector<3x7xbf16>
    %cst_31 = arith.constant dense<0.000000e+00> : vector<3x56xf32>
    %36 = tpu.matmul %35, %33, %cst_31 {dimension_numbers = #tpu.dot_dimension_numbers<[1], [0], [0], [1], [0, 0, 1, 1], [], []>} : vector<3x7xbf16>, vector<7x56xbf16>, vector<3x56xf32> -> vector<3x56xf32>
    %37 = arith.truncf %36 : vector<3x56xf32> to vector<3x56xbf16>
    %c0_32 = arith.constant 0 : index
    %c0_33 = arith.constant 0 : index
    %c0_34 = arith.constant 0 : index
    %38 = vector.load %arg7[%c0_32, %c0_33, %c0_34] : memref<3x56x24xbf16, #tpu.memory_space<vmem>>, vector<1x56x24xbf16>
    %39 = vector.shape_cast %38 : vector<1x56x24xbf16> to vector<56x24xbf16>
    %cst_35 = arith.constant dense<0.000000e+00> : vector<3x24xf32>
    %40 = tpu.matmul %37, %39, %cst_35 {dimension_numbers = #tpu.dot_dimension_numbers<[1], [0], [0], [1], [0, 0, 1, 1], [], []>} : vector<3x56xbf16>, vector<56x24xbf16>, vector<3x24xf32> -> vector<3x24xf32>
    %c1_36 = arith.constant 1 : index
    %c0_37 = arith.constant 0 : index
    %c0_38 = arith.constant 0 : index
    %41 = vector.load %arg6[%c1_36, %c0_37, %c0_38] : memref<3x3x7xbf16, #tpu.memory_space<vmem>>, vector<1x3x7xbf16>
    %42 = vector.shape_cast %41 : vector<1x3x7xbf16> to vector<3x7xbf16>
    %cst_39 = arith.constant dense<0.000000e+00> : vector<3x56xf32>
    %43 = tpu.matmul %42, %33, %cst_39 {dimension_numbers = #tpu.dot_dimension_numbers<[1], [0], [0], [1], [0, 0, 1, 1], [], []>} : vector<3x7xbf16>, vector<7x56xbf16>, vector<3x56xf32> -> vector<3x56xf32>
    %44 = arith.truncf %43 : vector<3x56xf32> to vector<3x56xbf16>
    %c1_40 = arith.constant 1 : index
    %c0_41 = arith.constant 0 : index
    %c0_42 = arith.constant 0 : index
    %45 = vector.load %arg7[%c1_40, %c0_41, %c0_42] : memref<3x56x24xbf16, #tpu.memory_space<vmem>>, vector<1x56x24xbf16>
    %46 = vector.shape_cast %45 : vector<1x56x24xbf16> to vector<56x24xbf16>
    %cst_43 = arith.constant dense<0.000000e+00> : vector<3x24xf32>
    %47 = tpu.matmul %44, %46, %cst_43 {dimension_numbers = #tpu.dot_dimension_numbers<[1], [0], [0], [1], [0, 0, 1, 1], [], []>} : vector<3x56xbf16>, vector<56x24xbf16>, vector<3x24xf32> -> vector<3x24xf32>
    %48 = arith.addf %40, %47 : vector<3x24xf32>
    %c2_44 = arith.constant 2 : index
    %c0_45 = arith.constant 0 : index
    %c0_46 = arith.constant 0 : index
    %49 = vector.load %arg6[%c2_44, %c0_45, %c0_46] : memref<3x3x7xbf16, #tpu.memory_space<vmem>>, vector<1x3x7xbf16>
    %50 = vector.shape_cast %49 : vector<1x3x7xbf16> to vector<3x7xbf16>
    %cst_47 = arith.constant dense<0.000000e+00> : vector<3x56xf32>
    %51 = tpu.matmul %50, %33, %cst_47 {dimension_numbers = #tpu.dot_dimension_numbers<[1], [0], [0], [1], [0, 0, 1, 1], [], []>} : vector<3x7xbf16>, vector<7x56xbf16>, vector<3x56xf32> -> vector<3x56xf32>
    %52 = arith.truncf %51 : vector<3x56xf32> to vector<3x56xbf16>
    %c2_48 = arith.constant 2 : index
    %c0_49 = arith.constant 0 : index
    %c0_50 = arith.constant 0 : index
    %53 = vector.load %arg7[%c2_48, %c0_49, %c0_50] : memref<3x56x24xbf16, #tpu.memory_space<vmem>>, vector<1x56x24xbf16>
    %54 = vector.shape_cast %53 : vector<1x56x24xbf16> to vector<56x24xbf16>
    %cst_51 = arith.constant dense<0.000000e+00> : vector<3x24xf32>
    %55 = tpu.matmul %52, %54, %cst_51 {dimension_numbers = #tpu.dot_dimension_numbers<[1], [0], [0], [1], [0, 0, 1, 1], [], []>} : vector<3x56xbf16>, vector<56x24xbf16>, vector<3x24xf32> -> vector<3x24xf32>
    %56 = arith.addf %48, %55 : vector<3x24xf32>
    %c0_52 = arith.constant 0 : index
    %c0_53 = arith.constant 0 : index
    %57 = vector.load %arg8[%c0_52, %c0_53] : memref<1x24xf32, #tpu.memory_space<vmem>>, vector<1x24xf32>
    %58 = vector.broadcast %57 : vector<1x24xf32> to vector<3x24xf32>
    %59 = arith.mulf %56, %58 : vector<3x24xf32>
    %c0_54 = arith.constant 0 : index
    %c0_55 = arith.constant 0 : index
    %60 = vector.load %arg9[%c0_54, %c0_55] : memref<1x24xf32, #tpu.memory_space<vmem>>, vector<1x24xf32>
    %61 = vector.broadcast %60 : vector<1x24xf32> to vector<3x24xf32>
    %62 = arith.addf %59, %61 : vector<3x24xf32>
    %cst_56 = arith.constant 0.000000e+00 : f32
    %63 = vector.broadcast %cst_56 : f32 to vector<3x24xf32>
    %64 = arith.maximumf %62, %63 : vector<3x24xf32>
    %65 = arith.truncf %64 : vector<3x24xf32> to vector<3x24xbf16>
    %c0_57 = arith.constant 0 : index
    %c0_58 = arith.constant 0 : index
    %66 = vector.load %arg10[%c0_57, %c0_58] : memref<24x32xbf16, #tpu.memory_space<vmem>>, vector<24x32xbf16>
    %cst_59 = arith.constant dense<0.000000e+00> : vector<3x32xf32>
    %67 = tpu.matmul %65, %66, %cst_59 {dimension_numbers = #tpu.dot_dimension_numbers<[1], [0], [0], [1], [0, 0, 1, 1], [], []>} : vector<3x24xbf16>, vector<24x32xbf16>, vector<3x32xf32> -> vector<3x32xf32>
    %c0_60 = arith.constant 0 : index
    %c0_61 = arith.constant 0 : index
    %68 = vector.load %arg11[%c0_60, %c0_61] : memref<1x32xf32, #tpu.memory_space<vmem>>, vector<1x32xf32>
    %69 = vector.broadcast %68 : vector<1x32xf32> to vector<3x32xf32>
    %70 = arith.addf %67, %69 : vector<3x32xf32>
    %c0_62 = arith.constant 0 : index
    %c0_63 = arith.constant 0 : index
    %c0_64 = arith.constant 0 : index
    %71 = vector.load %arg12[%c0_62, %c0_63, %c0_64] : memref<1x3x32xf32, #tpu.memory_space<vmem>>, vector<1x3x32xf32>
    %72 = vector.shape_cast %71 : vector<1x3x32xf32> to vector<3x32xf32>
    %73 = vector.shape_cast %70 : vector<3x32xf32> to vector<1x3x32xf32>
    tpu.vector_store %arg12[%c0_62, %c0_63, %c0_64], %73 {strides = array<i32>} : memref<1x3x32xf32, #tpu.memory_space<vmem>>, vector<1x3x32xf32>,
    return
  }
  func.func @transform_0(%arg0: i32) -> (i32, i32, i32) {
    %c0_i32 = arith.constant 0 : i32
    %c0_i32_0 = arith.constant 0 : i32
    %c0_i32_1 = arith.constant 0 : i32
    return %arg0, %c0_i32, %c0_i32_0 : i32, i32, i32
  }
  func.func @transform_1(%arg0: i32) -> (i32, i32, i32) {
    %c0_i32 = arith.constant 0 : i32
    %c0_i32_0 = arith.constant 0 : i32
    %c0_i32_1 = arith.constant 0 : i32
    %c0_i32_2 = arith.constant 0 : i32
    return %c0_i32, %c0_i32_0, %c0_i32_1 : i32, i32, i32
  }
  func.func @transform_2(%arg0: i32) -> (i32, i32, i32) {
    %c0_i32 = arith.constant 0 : i32
    %c0_i32_0 = arith.constant 0 : i32
    %c0_i32_1 = arith.constant 0 : i32
    %c0_i32_2 = arith.constant 0 : i32
    return %c0_i32, %c0_i32_0, %c0_i32_1 : i32, i32, i32
  }
  func.func @transform_3(%arg0: i32) -> (i32, i32) {
    %c0_i32 = arith.constant 0 : i32
    %c0_i32_0 = arith.constant 0 : i32
    %c0_i32_1 = arith.constant 0 : i32
    return %c0_i32, %c0_i32_0 : i32, i32
  }
  func.func @transform_4(%arg0: i32) -> (i32, i32) {
    %c0_i32 = arith.constant 0 : i32
    %c0_i32_0 = arith.constant 0 : i32
    %c0_i32_1 = arith.constant 0 : i32
    return %c0_i32, %c0_i32_0 : i32, i32
  }
  func.func @transform_5(%arg0: i32) -> (i32, i32, i32) {
    %c0_i32 = arith.constant 0 : i32
    %c0_i32_0 = arith.constant 0 : i32
    %c0_i32_1 = arith.constant 0 : i32
    %c0_i32_2 = arith.constant 0 : i32
    return %c0_i32, %c0_i32_0, %c0_i32_1 : i32, i32, i32
  }
  func.func @transform_6(%arg0: i32) -> (i32, i32, i32) {
    %c0_i32 = arith.constant 0 : i32
    %c0_i32_0 = arith.constant 0 : i32
    %c0_i32_1 = arith.constant 0 : i32
    %c0_i32_2 = arith.constant 0 : i32
    return %c0_i32, %c0_i32_0, %c0_i32_1 : i32, i32, i32
  }
  func.func @transform_7(%arg0: i32) -> (i32, i32) {
    %c0_i32 = arith.constant 0 : i32
    %c0_i32_0 = arith.constant 0 : i32
    %c0_i32_1 = arith.constant 0 : i32
    return %c0_i32, %c0_i32_0 : i32, i32
  }
  func.func @transform_8(%arg0: i32) -> (i32, i32) {
    %c0_i32 = arith.constant 0 : i32
    %c0_i32_0 = arith.constant 0 : i32
    %c0_i32_1 = arith.constant 0 : i32
    return %c0_i32, %c0_i32_0 : i32, i32
  }
  func.func @transform_9(%arg0: i32) -> (i32, i32) {
    %c0_i32 = arith.constant 0 : i32
    %c0_i32_0 = arith.constant 0 : i32
    %c0_i32_1 = arith.constant 0 : i32
    return %c0_i32, %c0_i32_0 : i32, i32
  }
  func.func @transform_10(%arg0: i32) -> (i32, i32) {
    %c0_i32 = arith.constant 0 : i32
    %c0_i32_0 = arith.constant 0 : i32
    %c0_i32_1 = arith.constant 0 : i32
    return %c0_i32, %c0_i32_0 : i32, i32
  }
  func.func @transform_11(%arg0: i32) -> (i32, i32, i32) {
    %c0_i32 = arith.constant 0 : i32
    %c0_i32_0 = arith.constant 0 : i32
    %c0_i32_1 = arith.constant 0 : i32
    return %arg0, %c0_i32, %c0_i32_0 : i32, i32, i32
  }
}

</mosaic_0001>

<bundles_post_ra>
// kernel: tpu_custom_call.1
= control target key start
LH: loop header
LB: loop body
LE: loop exit
PB: predicated region body
PF: predicated region fallthrough
CT: control target
= control target key end

     0   :  { %s1532_s17 = smov 0   ;;  %s1703_s0 = inlined_call_operand.vmem [shape: bf16[2,16,16], index: 0, kind: input, shape index: {}]   ;;  %s1704_s1 = inlined_call_operand.vmem [shape: bf16[3,7,16], index: 1, kind: input, shape index: {}]   ;;  %s1705_s2 = inlined_call_operand.vmem [shape: bf16[3,16,56], index: 2, kind: input, shape index: {}]   ;;  %s1706_s3 = inlined_call_operand.vmem [shape: f32[1,56], index: 3, kind: input, shape index: {}]   ;;  %s1707_s4 = inlined_call_operand.vmem [shape: f32[1,56], index: 4, kind: input, shape index: {}]   ;;  %s1708_s5 = inlined_call_operand.vmem [shape: bf16[3,3,7], index: 5, kind: input, shape index: {}]   ;;  %s1709_s6 = inlined_call_operand.vmem [shape: bf16[3,56,24], index: 6, kind: input, shape index: {}]   ;;  %s1710_s7 = inlined_call_operand.vmem [shape: f32[1,24], index: 7, kind: input, shape index: {}]   ;;  %s1711_s8 = inlined_call_operand.vmem [shape: f32[1,24], index: 8, kind: input, shape index: {}]   ;;  %s1712_s9 = inlined_call_operand.vmem [shape: bf16[24,32], index: 9, kind: input, shape index: {}]   ;;  %s1713_s10 = inlined_call_operand.vmem [shape: f32[1,32], index: 10, kind: input, shape index: {}]   ;;  %s1714_s11 = inlined_call_operand.vmem [shape: f32[2,3,32], index: 11, kind: output, shape index: {}]  }
   0x1 LB: > { %s1216_s18 = sadd.s32 4294967295, %s1467_s17   ;;  %p1220_p0 = scmp.ge.s32.totalorder %s1467_s17, 1  ;;  %s1467_s17 = sphi %s1532_s17, %s21_s17  }
   0x2   : > { %p337_p1 = scmp.lt.s32.totalorder %s1467_s17, 3 }
   0x4   : > { %p338_p2 = pnand %p1220_p0, %p337_p1 }
   0x5   : > { %p376_p3 = scmp.lt.s32.totalorder (!%p338_p2), %s1216_s18, 1  ;;  %v1469_v0 = vmov (!%p338_p2), 0.0   ;;  %vm1470_vm0 = vmmov (!%p338_p2), 0   ;;  %vm395_vm1 = vcmask (!%p338_p2), 130048   ;;  %v1226_v2 = vld [vmem:[%s1704_s1 + $0x4] sm:$0xf] (!%p338_p2) }
   0x6   : > { %341 = sbr.rel (%p338_p2) target bundleno = 1364 (0x554), region = 64  ;;  %1327 = vmatprep.subr.bf16.mxu1 (!%p338_p2), %v1469_v0  ;;  %1329 = vmatprep.mubr.msk.bf16.mxu1 (!%p338_p2), %vm1470_vm0, %v1469_v0  ;;  %v388_v3 = vld [vmem:[%s1704_s1] sm:$0xf] (!%p338_p2)  ;;  %v1234_v4 = vld [vmem:[%s1704_s1 + $0x8] sm:$0xf] (!%p338_p2)  ;;  %v1446_v21 = vld [vmem:[%s1705_s2 + $0x10] sm:$0xff] (!%p338_p2)  }
   0x7   : > { %1321 = vmatprep.subr.bf16.mxu0 (!%p338_p2), %v1469_v0  ;;  %1323 = vmatprep.mubr.msk.bf16.mxu0 (!%p338_p2), %vm1470_vm0, %v1469_v0  ;;  %v1444_v5 = vld [vmem:[%s1705_s2 + $0x8] sm:$0xff] (!%p338_p2)   ;;  %v1445_v7 = vld [vmem:[%s1705_s2] sm:$0xff] (!%p338_p2)   ;;  %v1451_v25 = vld [vmem:[%s1709_s6 + $0x10] sm:$0xff] (!%p338_p2)   ;;  %vm711_vm2 = vcmask (!%p338_p2), 1042432   ;;  %vm712_vm3 = vcmask (!%p338_p2), 1043456   ;;  %v1471_v33 = vmov (!%p338_p2), 65535  }
   0x8   : > { %v1447_v23 = vld [vmem:[%s1709_s6] sm:$0xff] (!%p338_p2)   ;;  %v1449_v24 = vld [vmem:[%s1709_s6 + $0x8] sm:$0xff] (!%p338_p2)   ;;  %v713_v34 = vsel (!%p338_p2), %vm711_vm2, 4294967295, %v1471_v33  ;;  %vm707_vm4 = vcmask (!%p338_p2), 56320   ;;  %v1453_v44 = vld [vmem:[%s1709_s6 + $0x18] ss:$0 sps:$4 sm:$0xff] (!%p338_p2)  }
   0x9   : > { %v1240_v26 = vld [vmem:[%s1706_s3] ss:$0 sm:$0xff] (!%p338_p2)  ;;  %v714_v37 = vsel (!%p338_p2), %vm712_vm3, %v713_v34, 0  ;;  %v1243_v41 = vld [vmem:[%s1708_s5 + $0x2] sm:$0x3] (!%p338_p2)  ;;  %v1450_v43 = vld [vmem:[%s1709_s6 + $0x24] sm:$0xff] (!%p338_p2)  }
   0xa   : > { %v1241_v28 = vld [vmem:[%s1707_s4] ss:$0 sm:$0xff] (!%p338_p2)  ;;  %v913_v45 = vsel (!%p338_p2), %vm712_vm3, %v1453_v44, 0  ;;  %v1452_v46 = vld [vmem:[%s1709_s6 + $0x2c] sm:$0xff] (!%p338_p2)   ;;  %v1454_v47 = vld [vmem:[%s1709_s6 + $0x34] ss:$0 sps:$4 sm:$0xff] (!%p338_p2)  }
   0xb   : > { %v706_v40 = vld [vmem:[%s1708_s5] sm:$0x3] (!%p338_p2)  ;;  %v846_v48 = vsel (!%p338_p2), %vm712_vm3, %v1454_v47, 0  ;;  %vm841_vm5 = vcmask (!%p338_p2), 457728   ;;  %v1455_v50 = vld [vmem:[%s1709_s6 + $0x38] sm:$0xff] (!%p338_p2)   ;;  %v1457_v62 = vld [vmem:[%s1709_s6 + $0x48] sm:$0xff] (!%p338_p2)  }
   0xc   : > { %v1448_v42 = vld [vmem:[%s1709_s6 + $0x1c] sm:$0xff] (!%p338_p2)   ;;  %v1262_v61 = vld [vmem:[%s1708_s5 + $0x4] sm:$0x3] (!%p338_p2)  ;;  %v1458_v63 = vld [vmem:[%s1709_s6 + $0x50] ss:$0 sps:$4 sm:$0xff] (!%p338_p2)   ;;  %vm1114_vm6 = vcmask (!%p338_p2), 195584  }
   0xd   : > { %s1716_s18 = smov (!%p376_p3, %s1216_s18), 1  ;;  %v1456_v55 = vld [vmem:[%s1709_s6 + $0x40] sm:$0xff]   ;;  %vm1161_vm7 = vcmask 256000  }
   0xe   : > { %s1284_s19 = sshll.u32 %s1716_s18, 3  ;;  %s1223_s26 = sshll.u32 %s1716_s18, 2 }
   0xf   : > { %s380_s22 = scalar_lea.vmem %s1703_s0, %s1284_s19  ;;  %s384_s12 = scalar_lea.vmem %s1714_s11, %s1223_s26 }
  0x10   : > { %v1443_v1 = vld [vmem:[%s380_s22] sm:$0xff]  }
  0x11   : > { %1328 = vmatpush3.bf16.msra.mxu1 %v1443_v1  ;;  %1322 = vmatpush3.bf16.msra.mxu0 %v1443_v1 }
  0x12   : > { %1345 = vmatprep.subr.bf16.mxu1 %v1469_v0  ;;  %1333 = vmatprep.subr.bf16.mxu0 %v1469_v0 }
  0x14   : > { %1330 = vmatmul.mubr.msk.bf16.vlgmr.msra.gmra.mrb[0].mxu1 %vm395_vm1, %v1226_v2  ;;  %1324 = vmatmul.mubr.msk.bf16.vlgmr.msra.gmra.mrb[0].mxu0 %vm395_vm1, %v388_v3 }
  0x15   : > { %1346 = vmatpush3.bf16.msra.mxu1 %v1443_v1  ;;  %1347 = vmatprep.mubr.msk.bf16.mxu1 %vm1470_vm0, %v1469_v0  ;;  %v1034_v1 = vsel %vm712_vm3, %v1458_v63, 0 }
  0x16   : > { %1335 = vmatprep.mubr.msk.bf16.mxu0 %vm1470_vm0, %v1469_v0  ;;  %1357 = vmatprep.subr.bf16.mxu1 %v1469_v0 }
  0x17   : > { %1334 = vmatpush3.bf16.msra.mxu0 %v1444_v5 }
  0x18   : > { %1339 = vmatprep.subr.bf16.mxu0 %v1469_v0 }
  0x1c   : > { %1348 = vmatmul.mubr.msk.bf16.vlgmr.msra.gmra.mrb[4].mxu1 %vm395_vm1, %v1234_v4 }
  0x1d   : > { %1359 = vmatprep.mubr.msk.bf16.mxu1 %vm1470_vm0, %v1469_v0 }
  0xe7   : > { %v481_v6 = vpop.f32.mrb[0].mxu1  ;;  %v433_v8 = vpop.f32.mrb[0].mxu0 }
  0xe8   : > { %v487_v9 = vpack.c.bf16 %v481_v6, %v481_v6  ;;  %v1331_v10 = vpop.f32.mrb[1].mxu1  ;;  %v1325_v11 = vpop.f32.mrb[1].mxu0  ;;  %v439_v19 = vpack.c.bf16 %v433_v8, %v433_v8 }
  0xe9   : > { %v484_v12 = vpop.f32.mrb[2].mxu1  ;;  %v436_v13 = vpop.f32.mrb[2].mxu0  ;;  %v1459_v11 = vld [vmem:[%s1712_s9] sm:$0xff]  }
  0xea   : > { %v1332_v14 = vpop.f32.mrb[3].mxu1  ;;  %1336 = vmatmul.mubr.msk.bf16.vlgmr.msra.gmra.mrb[4].mxu0 %vm395_vm1, %v487_v9  ;;  %v1326_v15 = vpop.f32.mrb[3].mxu0  ;;  %v1460_v12 = vld [vmem:[%s1712_s9 + $0x8] ss:$0 sps:$4 sm:$0xff]  }
  0xeb   : > { %1340 = vmatpush3.bf16.msra.mxu0 %v1445_v7  ;;  %1341 = vmatprep.mubr.msk.bf16.mxu0 %vm1470_vm0, %v1469_v0  ;;  %v1119_v13 = vsel %vm712_vm3, %v1460_v12, 0  ;;  %v1276_v15 = vld [vmem:[%s1710_s7] ss:$0 sm:$0xff] }
  0xec   : > { %1351 = vmatprep.subr.bf16.mxu0 %v1469_v0 }
  0xef   : > { %v628_v16 = vpop.f32.mrb[4].mxu1 }
  0xf0   : > { %v1349_v17 = vpop.f32.mrb[5].mxu1  ;;  %v634_v22 = vpack.c.bf16 %v628_v16, %v628_v16 }
  0xf1   : > { %v631_v18 = vpop.f32.mrb[6].mxu1 }
  0xf2   : > { %v1350_v20 = vpop.f32.mrb[7].mxu1  ;;  %v1277_v18 = vld [vmem:[%s1711_s8] ss:$0 sm:$0xff] }
  0xf6   : > { %1342 = vmatmul.mubr.msk.bf16.vlgmr.msra.gmra.mrb[4].mxu0 %vm395_vm1, %v439_v19 }
  0xf7   : > { %1352 = vmatpush3.bf16.msra.mxu0 %v1446_v21  ;;  %1353 = vmatprep.mubr.msk.bf16.mxu0 %vm1470_vm0, %v1469_v0 }
  0xf8   : > { %1381 = vmatprep.subr.bf16.mxu0 %v1469_v0 }
 0x102   : > { %1354 = vmatmul.mubr.msk.bf16.vlgmr.msra.gmra.mrb[4].mxu0 %vm395_vm1, %v634_v22 }
 0x103   : > { %1389 = vmatprep.mubr.msk.bf16.mxu0 %vm1470_vm0, %v1469_v0  ;;  %1382 = vmatpush3.bf16.msra.mxu0 %v1447_v23 }
 0x104   : > { %1383 = vmatprep.subr.bf16.mxu0 %v1469_v0 }
 0x107   : > { %1384 = vmatpush3.bf16.msra.mxu0 %v1449_v24  ;;  %v1278_v24 = vld [vmem:[%s1713_s10] ss:$0 sm:$0xff] }
 0x108   : > { %1385 = vmatprep.subr.bf16.mxu0 %v1469_v0 }
 0x10b   : > { %1386 = vmatpush3.bf16.msra.mxu0 %v1451_v25 }
 0x10c   : > { %1387 = vmatprep.subr.bf16.mxu0 %v1469_v0 }
 0x10f   : > { %1388 = vmatpush3.bf16.msra.mxu0 %v913_v45 }
 0x110   : > { %1399 = vmatprep.subr.bf16.mxu0 %v1469_v0 }
 0x1d5   : > { %v681_v27 = vpop.f32.mrb[4].mxu0 }
 0x1d6   : > { %v695_v29 = vmul.f32 %v1240_v26, %v681_v27  ;;  %v1355_v30 = vpop.f32.mrb[5].mxu0 }
 0x1d7   : > { %v684_v31 = vpop.f32.mrb[6].mxu0 }
 0x1d8   : > { %v703_v32 = vadd.f32 %v1241_v28, %v695_v29  ;;  %v1356_v35 = vpop.f32.mrb[7].mxu0 }
 0x1da   : > { %v704_v36 = vmax.f32 %v703_v32, 0.0 }
 0x1dc   : > { %v705_v38 = vpack.c.bf16 %v704_v36, %v704_v36 }
 0x1de   : > { %v716_v39 = vand.u32 %v714_v37, %v705_v38 }
 0x1e0   : > { %1358 = vmatpush3.bf16.msra.mxu1 %v716_v39 }
 0x1e1   : > { %1363 = vmatprep.subr.bf16.mxu1 %v1469_v0 }
 0x1e3   : > { %1360 = vmatmul.mubr.msk.bf16.vlgmr.msra.gmra.mrb[8].mxu1 %vm707_vm4, %v706_v40 }
 0x1e4   : > { %1364 = vmatpush3.bf16.msra.mxu1 %v716_v39  ;;  %1365 = vmatprep.mubr.msk.bf16.mxu1 %vm1470_vm0, %v1469_v0 }
 0x1e5   : > { %1369 = vmatprep.subr.bf16.mxu1 %v1469_v0 }
 0x1eb   : > { %1366 = vmatmul.mubr.msk.bf16.vlgmr.msra.gmra.mrb[12].mxu1 %vm707_vm4, %v1243_v41 }
 0x1ec   : > { %1370 = vmatpush3.bf16.msra.mxu1 %v1448_v42  ;;  %1377 = vmatprep.mubr.msk.bf16.mxu1 %vm1470_vm0, %v1469_v0 }
 0x1ed   : > { %1371 = vmatprep.subr.bf16.mxu1 %v1469_v0 }
 0x1f0   : > { %1372 = vmatpush3.bf16.msra.mxu1 %v1450_v43 }
 0x1f1   : > { %1373 = vmatprep.subr.bf16.mxu1 %v1469_v0 }
 0x1f4   : > { %1374 = vmatpush3.bf16.msra.mxu1 %v1452_v46 }
 0x1f5   : > { %1375 = vmatprep.subr.bf16.mxu1 %v1469_v0 }
 0x1f8   : > { %1376 = vmatpush3.bf16.msra.mxu1 %v846_v48 }
 0x1f9   : > { %1393 = vmatprep.subr.bf16.mxu1 %v1469_v0 }
 0x2b6   : > { %v752_v49 = vpop.f32.mrb[8].mxu1 }
 0x2b7   : > { %v758_v51 = vpack.c.bf16 %v752_v49, %v752_v49  ;;  %v1361_v52 = vpop.f32.mrb[9].mxu1 }
 0x2b8   : > { %v755_v53 = vpop.f32.mrb[10].mxu1 }
 0x2b9   : > { %v1362_v54 = vpop.f32.mrb[11].mxu1  ;;  %1390 = vmatmul.mubr.msk.bf16.vlgmr.msra.gmra.mrb[8].mxu0 %vm841_vm5, %v758_v51 }
 0x2ba   : > { %1400 = vmatpush3.bf16.msra.mxu0 %v1455_v50  ;;  %1407 = vmatprep.mubr.msk.bf16.mxu0 %vm1470_vm0, %v1469_v0 }
 0x2bb   : > { %1401 = vmatprep.subr.bf16.mxu0 %v1469_v0 }
 0x2be   : > { %v805_v56 = vpop.f32.mrb[12].mxu1  ;;  %1402 = vmatpush3.bf16.msra.mxu0 %v1456_v55 }
 0x2bf   : > { %v811_v57 = vpack.c.bf16 %v805_v56, %v805_v56  ;;  %v1367_v58 = vpop.f32.mrb[13].mxu1  ;;  %1403 = vmatprep.subr.bf16.mxu0 %v1469_v0 }
 0x2c0   : > { %v808_v59 = vpop.f32.mrb[14].mxu1 }
 0x2c1   : > { %1378 = vmatmul.mubr.msk.bf16.vlgmr.msra.gmra.mrb[16].mxu1 %vm841_vm5, %v811_v57  ;;  %v1368_v60 = vpop.f32.mrb[15].mxu1 }
 0x2c2   : > { %1394 = vmatpush3.bf16.msra.mxu1 %v716_v39  ;;  %1395 = vmatprep.mubr.msk.bf16.mxu1 %vm1470_vm0, %v1469_v0 }
 0x2c3   : > { %1411 = vmatprep.subr.bf16.mxu1 %v1469_v0  ;;  %1404 = vmatpush3.bf16.msra.mxu0 %v1457_v62 }
 0x2c4   : > { %1405 = vmatprep.subr.bf16.mxu0 %v1469_v0 }
 0x2c7   : > { %1406 = vmatpush3.bf16.msra.mxu0 %v1034_v1 }
 0x2c9   : > { %1396 = vmatmul.mubr.msk.bf16.vlgmr.msra.gmra.mrb[20].mxu1 %vm707_vm4, %v1262_v61 }
 0x2ca   : > { %1415 = vmatprep.mubr.msk.bf16.mxu1 %vm1470_vm0, %v1469_v0  ;;  %1412 = vmatpush3.bf16.msra.mxu1 %v1459_v11 }
 0x2cb   : > { %1413 = vmatprep.subr.bf16.mxu1 %v1469_v0 }
 0x2ce   : > { %1414 = vmatpush3.bf16.msra.mxu1 %v1119_v13 }
 0x394   : > { %v882_v2 = vpop.f32.mrb[16].mxu1 }
 0x395   : > { %v1379_v3 = vpop.f32.mrb[17].mxu1 }
 0x396   : > { %v885_v4 = vpop.f32.mrb[18].mxu1 }
 0x397   : > { %v1380_v5 = vpop.f32.mrb[19].mxu1 }
 0x39c   : > { %v994_v6 = vpop.f32.mrb[20].mxu1 }
 0x39d   : > { %v1000_v7 = vpack.c.bf16 %v994_v6, %v994_v6  ;;  %v1397_v8 = vpop.f32.mrb[21].mxu1 }
 0x39e   : > { %v997_v9 = vpop.f32.mrb[22].mxu1 }
 0x39f   : > { %1408 = vmatmul.mubr.msk.bf16.vlgmr.msra.gmra.mrb[8].mxu0 %vm841_vm5, %v1000_v7  ;;  %v1398_v10 = vpop.f32.mrb[23].mxu1 }
 0x472   : > { %v1070_v14 = vpop.f32.mrb[8].mxu0 }
 0x473   : > { %v1419_v16 = vadd.f32 %v1070_v14, %v882_v2  ;;  %v1409_v17 = vpop.f32.mrb[9].mxu0 }
 0x474   : > { %v1073_v0 = vpop.f32.mrb[10].mxu0 }
 0x475   : > { %v1084_v19 = vmul.f32 %v1419_v16, %v1276_v15  ;;  %v1410_v20 = vpop.f32.mrb[11].mxu0 }
 0x477   : > { %v1092_v21 = vadd.f32 %v1277_v18, %v1084_v19 }
 0x479   : > { %v1093_v22 = vmax.f32 %v1092_v21, 0.0 }
 0x47b   : > { %v1094_v23 = vpack.c.bf16 %v1093_v22, %v1093_v22 }
 0x47d   : > { %1416 = vmatmul.mubr.msk.bf16.vlgmr.msra.gmra.mrb[24].mxu1 %vm1114_vm6, %v1094_v23 }
 0x550   : > { %v1155_v25 = vpop.f32.mrb[24].mxu1 }
 0x551   : > { %v1156_v26 = vadd.f32 %v1278_v24, %v1155_v25  ;;  %v1417_v27 = vpop.f32.mrb[25].mxu1 }
 0x552   : > { %v1158_v28 = vpop.f32.mrb[26].mxu1 }
 0x553   : > { %1162 = vst.msk [vmem:[%s384_s12] sm:$0x7] %vm1161_vm7, %v1156_v26  ;;  %v1418_v29 = vpop.f32.mrb[27].mxu1 }
 0x554 PF: > { %s21_s17 = sadd.s32 1, %s1467_s17  }
 0x555   : > { %p18_p4 = scmp.ge.s32.totalorder %s21_s17, 4  }
 0x557   :  { %20 = sbr.rel (!%p18_p4) target bundleno = 1 (0x1), region = 102 }

</bundles_post_ra>
